<compile_context>
chip_gen: v5e
topology: v5e:2x2
jax: 0.10.0
libtpu: 0.0.40
codegen_flags: <defaults>
</compile_context>

<pallas_src>
import functools

import jax
import jax.numpy as jnp
from jax import lax
from jax.experimental import pallas as pl
from jax.experimental.pallas import tpu as pltpu


def _round_up(a: int, b: int) -> int:
    return (a + b - 1) // b * b


def _cdiv(a: int, b: int) -> int:
    return (a + b - 1) // b


def _vmem_capacity_bytes() -> int:
    try:
        return int(pltpu.get_tpu_info().vmem_capacity_bytes)
    except Exception:
        return 64 * 1024 * 1024  # conservative (v7x per-TC VMEM)


def _multiproto_kernel(x_ref, rhs_ref, bias_ref, pw2_ref, out_ref, *, p_pad):
    """One row-tile of the forward pass.

    x_ref    : (TILE, D)              mxu dtype
    rhs_ref  : (P_pad + C_pad, D)     mxu dtype  = [ (2/T) * prototypes ; W1 ]
    bias_ref : (1, P_pad)             f32        = ||p||^2 / T  (1e30 on pad lanes)
    pw2_ref  : (P_pad, C_pad)         mxu dtype  = prototypes @ W2^T (zero-padded)
    out_ref  : (TILE, C_pad)          f32
    """
    x = x_ref[...]
    rhs = rhs_ref[...]

    # One fused MXU matmul: x @ [2/T*P ; W1]^T  ->  (TILE, P_pad + C_pad)
    t = lax.dot_general(x, rhs, (((1,), (1,)), ((), ())),
                        preferred_element_type=jnp.float32)
    # Shift-invariant softmax logits: (2*x.p - ||p||^2) / T ; pad lanes -> -1e30.
    logits = t[:, :p_pad] - bias_ref[...]          # (TILE, P_pad)  f32
    xw1 = t[:, p_pad:]                             # (TILE, C_pad)  f32 = x @ W1^T

    m = jnp.max(logits, axis=-1, keepdims=True)
    e = jnp.exp(logits - m)
    qj = e * pl.reciprocal(jnp.sum(e, axis=-1, keepdims=True), approx=True)

    # cj = x@W1^T + qj @ (P @ W2^T)   (== x@W1^T + (qj@P)@W2^T algebraically)
    cj = xw1 + jnp.dot(qj.astype(pw2_ref.dtype), pw2_ref[...],
                       preferred_element_type=jnp.float32)
    out_ref[...] = cj.astype(out_ref.dtype)


def multiproto_forward(samples, prototypes, w_out, *, temperature=1.0,
                       tile_n=512, mxu_dtype=jnp.bfloat16):
    """samples: (n_class, n_samples, D); prototypes: (P, D); w_out: (C, 2*D)."""
    n_class, n_samples, n_dim = samples.shape
    n = n_class * n_samples
    n_classes = w_out.shape[0]
    n_proto = prototypes.shape[0]

    LANE = 128
    p_pad_n = _round_up(n_proto, LANE)       # lane-dense prototype axis
    c_pad_n = _round_up(n_classes, LANE)     # lane-dense output-class axis

    itemsize = jnp.dtype(mxu_dtype).itemsize
    sub = max(8, 32 // max(itemsize, 1))     # sublane multiple: f32->8, bf16->16

    # ---- VMEM-budgeted row tile ------------------------------------------
    vmem_cap = _vmem_capacity_bytes()
    budget = int(vmem_cap * 0.45)
    # Grid-invariant operands (conservatively counted as double-buffered).
    const_bytes = 2 * itemsize * ((p_pad_n + c_pad_n) * n_dim + p_pad_n * c_pad_n)
    const_bytes += 2 * 4 * p_pad_n
    # Per-row bytes: x (2 bufs), out (2 bufs, f32) + f32 intermediates.
    per_row = (2 * itemsize * n_dim
               + 2 * 4 * c_pad_n
               + 4 * (p_pad_n + c_pad_n)      # fused matmul result
               + 3 * 4 * p_pad_n              # logits / exp / qj
               + 4 * c_pad_n)                 # cj
    tile_cap = max(sub, (budget - const_bytes) // per_row)
    tile_cap = min(int(tile_n), int(tile_cap))
    tile_cap = max(sub, (tile_cap // sub) * sub)

    # Minimize padding waste; force >= 2 grid steps (both v7x TensorCores) when
    # N is large enough to split.
    num_tiles = _cdiv(n, tile_cap)
    if n >= 2 * sub:
        num_tiles = max(num_tiles, 2)
    tile = _round_up(_cdiv(n, num_tiles), sub)
    n_pad = num_tiles * tile

    # ---- operand preparation (plain JAX, runs once) ------------------------
    x = samples.reshape(n, n_dim).astype(jnp.float32)
    if n_pad != n:
        x = jnp.pad(x, ((0, n_pad - n), (0, 0)))

    p = prototypes.astype(jnp.float32)
    scale = 2.0 / float(temperature)
    p_scaled = jnp.pad(scale * p, ((0, p_pad_n - n_proto), (0, 0)))       # (P_pad, D)
    w1 = jnp.pad(w_out[:, :n_dim].astype(jnp.float32),
                 ((0, c_pad_n - n_classes), (0, 0)))                      # (C_pad, D)
    w2 = w_out[:, n_dim:].astype(jnp.float32)                             # (C, D)
    fused_rhs = jnp.concatenate([p_scaled, w1], axis=0)                   # (P_pad+C_pad, D)

    # pw2 = prototypes @ W2^T, zero padded to (P_pad, C_pad).
    pw2 = jnp.zeros((p_pad_n, c_pad_n), jnp.float32)
    pw2 = pw2.at[:n_proto, :n_classes].set(p @ w2.T)

    # Softmax bias: ||p||^2 / T for real prototypes, +1e30 masks padded lanes.
    p_sq = jnp.sum(p * p, axis=-1) / float(temperature)                   # (P,)
    bias = jnp.full((1, p_pad_n), 1e30, jnp.float32).at[0, :n_proto].set(p_sq)

    x_in = x.astype(mxu_dtype)
    rhs_in = fused_rhs.astype(mxu_dtype)
    pw2_in = pw2.astype(mxu_dtype)

    kernel = functools.partial(_multiproto_kernel, p_pad=p_pad_n)

    out = pl.pallas_call(
        kernel,
        out_shape=jax.ShapeDtypeStruct((n_pad, c_pad_n), jnp.float32),
        grid=(num_tiles,),
        in_specs=[
            pl.BlockSpec((tile, n_dim), lambda i: (i, 0)),                # x tile
            pl.BlockSpec((p_pad_n + c_pad_n, n_dim), lambda i: (0, 0)),    # [2/T*P ; W1]
            pl.BlockSpec((1, p_pad_n), lambda i: (0, 0)),                  # ||p||^2 / T
            pl.BlockSpec((p_pad_n, c_pad_n), lambda i: (0, 0)),            # P @ W2^T
        ],
        out_specs=pl.BlockSpec((tile, c_pad_n), lambda i: (i, 0)),
        compiler_params=pltpu.CompilerParams(
            dimension_semantics=("parallel",),
            vmem_limit_bytes=int(vmem_cap * 3 // 4)),
    )(x_in, rhs_in, bias, pw2_in)

    return out[:n, :n_classes]


def multiproto_forward_ref(samples, prototypes, w_out, *, temperature=1.0):
    """Pure-JAX reference matching the PyTorch forward (concat=True)."""
    n_class, n_samples, n_dim = samples.shape
    x = samples.reshape(n_class * n_samples, n_dim)
    d = jnp.sum((x[:, None, :] - prototypes[None, :, :]) ** 2, axis=-1)
    qj = jax.nn.softmax(-d / temperature, axis=1)
    x_tilde = qj @ prototypes
    return jnp.concatenate([x, x_tilde], axis=-1) @ w_out.T


def init_params(key, samples, n_proto, n_classes):
    """Deterministic stand-in for the module's __init__ (concat=True branch):
    prototypes = per-class subsample of `samples` + xavier-normal noise;
    output = Linear(2*D, n_classes, bias=False) with xavier-normal weight."""
    # TODO(synk): kmeans++ init branch (sklearn k_means) not replicated here.
    n_class, n_samples, n_dim = samples.shape
    n_proto_per_class = n_proto // n_classes
    n_proto = n_proto_per_class * n_class

    k_perm, k_noise, k_out = jax.random.split(key, 3)
    protos = []
    for i in range(n_classes):
        perm = jax.random.permutation(jax.random.fold_in(k_perm, i), n_samples)
        idx = perm[:n_proto_per_class]
        protos.append(samples[i, idx, :])
    init_proto = jnp.stack(protos, axis=0).reshape(n_proto, n_dim)
    std_p = (2.0 / (n_proto + n_dim)) ** 0.5
    init_proto = init_proto + std_p * jax.random.normal(k_noise, (n_proto, n_dim))

    std_w = (2.0 / (n_classes + 2 * n_dim)) ** 0.5
    w_out = std_w * jax.random.normal(k_out, (n_classes, 2 * n_dim))
    return init_proto.astype(jnp.float32), w_out.astype(jnp.float32)


if __name__ == "__main__":
    key = jax.random.PRNGKey(0)
    n_class, n_samples, n_dim = 4, 8, 32        # small few-shot episode
    n_classes = n_class
    n_proto = 8                                  # -> 2 prototypes per class

    k_samples, k_params = jax.random.split(key)
    samples = jax.random.normal(k_samples, (n_class, n_samples, n_dim), jnp.float32)
    prototypes, w_out = init_params(k_params, samples, n_proto, n_classes)

    cj_ref = multiproto_forward_ref(samples, prototypes, w_out, temperature=1.0)

    # Exact-math path (f32 MXU operands) -- tight check.
    cj_f32 = jax.block_until_ready(
        multiproto_forward(samples, prototypes, w_out, temperature=1.0,
                           mxu_dtype=jnp.float32))
    assert cj_f32.shape == (n_class * n_samples, n_classes)
    # tolerance covers the approx=True EUP reciprocal in the softmax normalizer
    assert jnp.allclose(cj_f32, cj_ref, atol=2e-3, rtol=2e-3), "f32 mismatch vs reference"

    # Default fast path (bf16 MXU operands, f32 accumulation) -- loose check,
    # since bf16 operand rounding perturbs the softmax logits.
    cj_bf16 = jax.block_until_ready(
        multiproto_forward(samples, prototypes, w_out, temperature=1.0))
    assert cj_bf16.shape == (n_class * n_samples, n_classes)
    assert jnp.allclose(cj_bf16, cj_ref, atol=3.5e-1, rtol=2.5e-1), "bf16 mismatch vs reference"

    print("KERNEL_OK")
</pallas_src>

<mosaic_0001>
module attributes {stable_mosaic.version = 11 : i64} {
  func.func @_multiproto_kernel(%arg0: i32, %arg1: memref<16x32xf32, #tpu.memory_space<vmem>>, %arg2: memref<256x32xf32, #tpu.memory_space<vmem>>, %arg3: memref<1x128xf32, #tpu.memory_space<vmem>>, %arg4: memref<128x128xf32, #tpu.memory_space<vmem>>, %arg5: memref<16x128xf32, #tpu.memory_space<vmem>>) attributes {dimension_semantics = [#tpu.dimension_semantics<parallel>], iteration_bounds = array<i64: 2>, scalar_prefetch = 0 : i64, scratch_operands = 0 : i64, tpu.core_type = #tpu.core_type<tc>, window_params = [{transform_indices = @transform_0, window_bounds = array<i64: 16, 32>}, {pipeline_mode = #tpu.pipeline_mode<synchronous>, transform_indices = @transform_1, window_bounds = array<i64: 256, 32>}, {pipeline_mode = #tpu.pipeline_mode<synchronous>, transform_indices = @transform_2, window_bounds = array<i64: 1, 128>}, {pipeline_mode = #tpu.pipeline_mode<synchronous>, transform_indices = @transform_3, window_bounds = array<i64: 128, 128>}, {transform_indices = @transform_4, window_bounds = array<i64: 16, 128>}]} {
    %c0 = arith.constant 0 : index
    %c0_0 = arith.constant 0 : index
    %0 = vector.load %arg1[%c0, %c0_0] : memref<16x32xf32, #tpu.memory_space<vmem>>, vector<16x32xf32>
    %c0_1 = arith.constant 0 : index
    %c0_2 = arith.constant 0 : index
    %1 = vector.load %arg2[%c0_1, %c0_2] : memref<256x32xf32, #tpu.memory_space<vmem>>, vector<256x32xf32>
    %cst = arith.constant dense<0.000000e+00> : vector<16x256xf32>
    %2 = tpu.matmul %0, %1, %cst {dimension_numbers = #tpu.dot_dimension_numbers<[1], [1], [0], [0], [0, 0, 1, 0], [], []>} : vector<16x32xf32>, vector<256x32xf32>, vector<16x256xf32> -> vector<16x256xf32>
    %3 = vector.extract_strided_slice %2 {offsets = [0, 0], sizes = [16, 128], strides = [1, 1]} : vector<16x256xf32> to vector<16x128xf32>
    %c0_3 = arith.constant 0 : index
    %c0_4 = arith.constant 0 : index
    %4 = vector.load %arg3[%c0_3, %c0_4] : memref<1x128xf32, #tpu.memory_space<vmem>>, vector<1x128xf32>
    %5 = vector.broadcast %4 : vector<1x128xf32> to vector<16x128xf32>
    %6 = arith.subf %3, %5 : vector<16x128xf32>
    %7 = vector.extract_strided_slice %2 {offsets = [0, 128], sizes = [16, 128], strides = [1, 1]} : vector<16x256xf32> to vector<16x128xf32>
    %cst_5 = arith.constant dense<0xFF800000> : vector<16xf32>
    %8 = vector.multi_reduction <maximumf>, %6, %cst_5 [1] : vector<16x128xf32> to vector<16xf32>
    %9 = vector.shape_cast %8 : vector<16xf32> to vector<16x1xf32>
    %10 = vector.broadcast %9 : vector<16x1xf32> to vector<16x128xf32>
    %11 = arith.subf %6, %10 : vector<16x128xf32>
    %12 = math.exp %11 : vector<16x128xf32>
    %cst_6 = arith.constant dense<0.000000e+00> : vector<16xf32>
    %13 = vector.multi_reduction <add>, %12, %cst_6 [1] : vector<16x128xf32> to vector<16xf32>
    %14 = vector.shape_cast %13 : vector<16xf32> to vector<16x1xf32>
    %15 = tpu.reciprocal %14 {approx = true} : vector<16x1xf32> -> vector<16x1xf32>
    %16 = vector.broadcast %15 : vector<16x1xf32> to vector<16x128xf32>
    %17 = arith.mulf %12, %16 : vector<16x128xf32>
    %c0_7 = arith.constant 0 : index
    %c0_8 = arith.constant 0 : index
    %18 = vector.load %arg4[%c0_7, %c0_8] : memref<128x128xf32, #tpu.memory_space<vmem>>, vector<128x128xf32>
    %cst_9 = arith.constant dense<0.000000e+00> : vector<16x128xf32>
    %19 = tpu.matmul %17, %18, %cst_9 {dimension_numbers = #tpu.dot_dimension_numbers<[1], [0], [0], [1], [0, 0, 1, 1], [], []>} : vector<16x128xf32>, vector<128x128xf32>, vector<16x128xf32> -> vector<16x128xf32>
    %20 = arith.addf %7, %19 : vector<16x128xf32>
    %c0_10 = arith.constant 0 : index
    %c0_11 = arith.constant 0 : index
    %21 = vector.load %arg5[%c0_10, %c0_11] : memref<16x128xf32, #tpu.memory_space<vmem>>, vector<16x128xf32>
    tpu.vector_store %arg5[%c0_10, %c0_11], %20 {strides = array<i32>} : memref<16x128xf32, #tpu.memory_space<vmem>>, vector<16x128xf32>,
    return
  }
  func.func @transform_0(%arg0: i32) -> (i32, i32) {
    %c0_i32 = arith.constant 0 : i32
    %c0_i32_0 = arith.constant 0 : i32
    return %arg0, %c0_i32 : i32, i32
  }
  func.func @transform_1(%arg0: i32) -> (i32, i32) {
    %c0_i32 = arith.constant 0 : i32
    %c0_i32_0 = arith.constant 0 : i32
    %c0_i32_1 = arith.constant 0 : i32
    return %c0_i32, %c0_i32_0 : i32, i32
  }
  func.func @transform_2(%arg0: i32) -> (i32, i32) {
    %c0_i32 = arith.constant 0 : i32
    %c0_i32_0 = arith.constant 0 : i32
    %c0_i32_1 = arith.constant 0 : i32
    return %c0_i32, %c0_i32_0 : i32, i32
  }
  func.func @transform_3(%arg0: i32) -> (i32, i32) {
    %c0_i32 = arith.constant 0 : i32
    %c0_i32_0 = arith.constant 0 : i32
    %c0_i32_1 = arith.constant 0 : i32
    return %c0_i32, %c0_i32_0 : i32, i32
  }
  func.func @transform_4(%arg0: i32) -> (i32, i32) {
    %c0_i32 = arith.constant 0 : i32
    %c0_i32_0 = arith.constant 0 : i32
    return %arg0, %c0_i32 : i32, i32
  }
}

</mosaic_0001>

<bundles_post_ra>
// kernel: tpu_custom_call.1
= control target key start
LH: loop header
LB: loop body
LE: loop exit
PB: predicated region body
PF: predicated region fallthrough
CT: control target
= control target key end

     0   :  { %9 = vsyncpa [#allocation3], 0  ;;  %s1024_s0 = inlined_call_operand.vmem [shape: f32[32,32], index: 0, kind: input, shape index: {}]   ;;  %s1025_s1 = inlined_call_operand.vmem [shape: f32[256,32], index: 1, kind: input, shape index: {}]   ;;  %s1026_s2 = inlined_call_operand.vmem [shape: f32[1,128], index: 2, kind: input, shape index: {}]   ;;  %s1027_s3 = inlined_call_operand.vmem [shape: f32[128,128], index: 3, kind: input, shape index: {}]   ;;  %s1028_s4 = inlined_call_operand.hbm [shape: f32[32,128], index: 4, kind: output, shape index: {}]  }
   0x1   :  { %11 = vsyncpa [#allocation3 + $0x1], 0  ;;  %s733_s15 = smov 0   ;;  %s735_s16 = smov 0  }
   0x2   :  { %s737_s17 = smov 0   ;;  %s739_s18 = smov 0  }
   0x3 LB: > { %s754_s19 = sadd.s32 4294967295, %s704_s18   ;;  %s527_s20 = sadd.s32 4294967294, %s704_s18   ;;  %s704_s18 = sphi %s739_s18, %s1034_s18   ;;  %s700_s17 = sphi %s737_s17, %s1033_s17   ;;  %s696_s16 = sphi %s735_s16, %s1032_s16   ;;  %s692_s15 = sphi %s733_s15, %s1031_s15  }
   0x4   : > { %s758_s21 = sadd.s32 1, %s704_s18   ;;  %s113_s22 = sadd.s32 1, %s700_s17 }
   0x5   : > { %s110_s23 = ssub.s32 %s704_s18, %s758_s21  ;;  %p123_p0 = scmp.ne.s32.totalorder %s700_s17, %s696_s16 }
   0x6   : > { %p111_p1 = scmp.eq.s32.totalorder %s110_s23, 0  ;;  %p124_p2 = scmp.eq.s32.totalorder %s754_s19, 1 }
   0x7   : > { %p129_p3 = scmp.ne.s32.totalorder %s696_s16, %s692_s15  ;;  %p130_p4 = scmp.eq.s32.totalorder %s527_s20, 1 }
   0x8   : > { %s769_s24 = scalar_select %p111_p1, %s700_s17, %s113_s22  }
   0x9   : > { %p771_p5 = por %p124_p2, %p123_p0  ;;  %p775_p6 = por %p130_p4, %p129_p3 }
   0xa   : > { %p530_p7 = scmp.ge.s32.totalorder %s704_s18, 1  ;;  %p166_p8 = scmp.lt.s32.totalorder %s704_s18, 3 }
   0xc   : > { %p167_p9 = pnand %p530_p7, %p166_p8 }
   0xd   : > { %s532_s8 = sshll.u32 (!%p167_p9), %s754_s19, 1  ;;  %s189_s28 = sand.u32 (!%p167_p9), 1, %s696_s16  }
   0xe   : > { %170 = sbr.rel (%p167_p9) target bundleno = 609 (0x261), region = 36  ;;  %p193_p10 = scmp.lt.s32.totalorder (!%p167_p9), %s532_s8, 3 }
   0xf   : > { %s575_s30 = sshll.u32 (!%p167_p9), %s754_s19, 4  ;;  %s450_s11 = scalar_lea.sflag (!%p167_p9), [#allocation3], %s189_s28 }
  0x10   : > { %s461_s7 = scalar_lea.hbm (!%p167_p9), %s1028_s4, %s575_s30 }
  0x11   : > { %s464_s10 = sshll.u32 (!%p167_p9), %s461_s7, 4  ;;  %s465_s10 = int_to_ptr.hbm [resolvable:$true] %s464_s10 }
  0x12   : > { %s656_s12 = sshra.s32 (!%p167_p9), %s465_s10, 4  ;;  %s657_s12 = int_to_ptr.hbm [resolvable:$true] %s656_s12 }
  0x13   : > { %v216_v0 = vld [vmem:[%s1025_s1 + $0x78] sm:$0xff]  ;;  %vm233_vm0 = vcmask 261120   ;;  %v215_v1 = vld [vmem:[%s1025_s1 + $0x70] sm:$0xff]  ;;  %v214_v2 = vld [vmem:[%s1025_s1 + $0x68] sm:$0xff]  ;;  %s1036_s8 = smov (!%p193_p10, %s532_s8), 3  ;;  %s658_s19 = scalar_lea.hbm %s657_s12, 16 }
  0x14   : > { %534 = vmatpush.xpose.msk.msra.mxu0 %vm233_vm0, %v216_v0  ;;  %576 = vmatpush.xpose.msk.msra.mxu3 %vm233_vm0, %v216_v0  ;;  %v213_v3 = vld [vmem:[%s1025_s1 + $0x60] sm:$0xff]  ;;  %v212_v4 = vld [vmem:[%s1025_s1 + $0x58] sm:$0xff]  ;;  %v211_v5 = vld [vmem:[%s1025_s1 + $0x50] sm:$0xff]  ;;  %s533_s20 = sshll.u32 %s1036_s8, 3  ;;  %p659_p11 = scmp.ne.s32.totalorder %s657_s12, %s658_s19 }
  0x15   : > { %v210_v6 = vld [vmem:[%s1025_s1 + $0x48] sm:$0xff]  ;;  %v209_v7 = vld [vmem:[%s1025_s1 + $0x40] sm:$0xff]  ;;  %v208_v8 = vld [vmem:[%s1025_s1 + $0x38] sm:$0xff]  ;;  %s196_s29 = scalar_lea.vmem %s1024_s0, %s533_s20  ;;  %s662_s20 = scalar_lea.hbm %s1028_s4, 32 }
  0x16   : > { %v207_v9 = vld [vmem:[%s1025_s1 + $0x30] sm:$0xff]  ;;  %v206_v10 = vld [vmem:[%s1025_s1 + $0x28] sm:$0xff]  ;;  %v205_v11 = vld [vmem:[%s1025_s1 + $0x20] sm:$0xff]  ;;  %p660_p12 = pnand %p659_p11, %p771_p5  ;;  %p663_p0 = scmp.lt.s32.totalorder %s657_s12, %s1028_s4 }
  0x17   : > { %v204_v12 = vld [vmem:[%s1025_s1 + $0x18] sm:$0xff]  ;;  %v203_v13 = vld [vmem:[%s1025_s1 + $0x10] sm:$0xff]  ;;  %v202_v14 = vld [vmem:[%s1025_s1 + $0x8] sm:$0xff]  ;;  %p664_p1 = scmp.lt.s32.totalorder %s662_s20, %s658_s19 }
  0x18   : > { %535 = vmatpush.xpose.msk.msra.mxu0 %vm233_vm0, %v215_v1  ;;  %577 = vmatpush.xpose.msk.msra.mxu3 %vm233_vm0, %v215_v1  ;;  %v201_v15 = vld [vmem:[%s1025_s1] sm:$0xff]  ;;  %v867_v17 = vld [vmem:[%s196_s29 + $0x8] sm:$0xff]  ;;  %v232_v23 = vld [vmem:[%s1025_s1 + $0xf8] sm:$0xff]  ;;  %p661_p13 = pneg %p660_p12 }
  0x19   : > { %v865_v16 = vld [vmem:[%s196_s29] sm:$0xff]  ;;  %552 = vmatpush.xpose.msk.msra.mxu1 %vm233_vm0, %v232_v23  ;;  %v231_v24 = vld [vmem:[%s1025_s1 + $0xf0] sm:$0xff]  ;;  %v421_v25 = vld [vmem:[%s1027_s3 + $0x78] sm:$0xff]  ;;  %s531_s29 = sshll.u32 %s189_s28, 4  ;;  %p665_p2 = por %p664_p1, %p663_p0 }
  0x1a   : > { %v633_v18 = vld [vmem:[%s1026_s2] ss:$0 sm:$0xff]  ;;  %422 = vmatpush.msra.mxu2 %v421_v25  ;;  %v420_v26 = vld [vmem:[%s1027_s3 + $0x70] sm:$0xff]  ;;  %v419_v27 = vld [vmem:[%s1027_s3 + $0x68] sm:$0xff]  ;;  %s191_s8 = scalar_lea.vmem [#allocation2], %s531_s29 }
  0x1b   : > { %v230_v28 = vld [vmem:[%s1025_s1 + $0xe8] sm:$0xff]  ;;  %v418_v29 = vld [vmem:[%s1027_s3 + $0x60] sm:$0xff]  ;;  %v417_v30 = vld [vmem:[%s1027_s3 + $0x58] sm:$0xff]  ;;  %s462_s9 = sshll.u32 %s191_s8, 4  ;;  %p666_p3 = pnand %p665_p2, %p661_p13  ;;  %s463_s9 = int_to_ptr.vmem [resolvable:$true] %s462_s9 }
  0x1c   : > { %536 = vmatpush.xpose.msk.msra.mxu0 %vm233_vm0, %v214_v2  ;;  %578 = vmatpush.xpose.msk.msra.mxu3 %vm233_vm0, %v214_v2  ;;  %v229_v31 = vld [vmem:[%s1025_s1 + $0xe0] sm:$0xff]  ;;  %v416_v32 = vld [vmem:[%s1027_s3 + $0x50] sm:$0xff]  ;;  %v415_v34 = vld [vmem:[%s1027_s3 + $0x48] sm:$0xff] }
  0x1d   : > { %553 = vmatpush.xpose.msk.msra.mxu1 %vm233_vm0, %v231_v24  ;;  %423 = vmatpush.msra.mxu2 %v420_v26  ;;  %v228_v36 = vld [vmem:[%s1025_s1 + $0xd8] sm:$0xff]  ;;  %v414_v37 = vld [vmem:[%s1027_s3 + $0x40] sm:$0xff]  ;;  %v227_v40 = vld [vmem:[%s1025_s1 + $0xd0] sm:$0xff] }
  0x1e   : > { %v413_v39 = vld [vmem:[%s1027_s3 + $0x38] sm:$0xff]  ;;  %v412_v41 = vld [vmem:[%s1027_s3 + $0x30] sm:$0xff]  ;;  %v411_v43 = vld [vmem:[%s1027_s3 + $0x28] sm:$0xff] }
  0x1f   : > { %424 = vmatpush.msra.mxu2 %v419_v27  ;;  %v226_v45 = vld [vmem:[%s1025_s1 + $0xc8] sm:$0xff]  ;;  %v225_v48 = vld [vmem:[%s1025_s1 + $0xc0] sm:$0xff]  ;;  %v224_v49 = vld [vmem:[%s1025_s1 + $0xb8] sm:$0xff] }
  0x20   : > { %537 = vmatpush.xpose.msk.msra.mxu0 %vm233_vm0, %v213_v3  ;;  %579 = vmatpush.xpose.msk.msra.mxu3 %vm233_vm0, %v213_v3  ;;  %v223_v51 = vld [vmem:[%s1025_s1 + $0xb0] sm:$0xff]  ;;  %v222_v52 = vld [vmem:[%s1025_s1 + $0xa8] sm:$0xff]  ;;  %v221_v53 = vld [vmem:[%s1025_s1 + $0xa0] sm:$0xff] }
  0x21   : > { %554 = vmatpush.xpose.msk.msra.mxu1 %vm233_vm0, %v230_v28  ;;  %425 = vmatpush.msra.mxu2 %v418_v29  ;;  %v220_v54 = vld [vmem:[%s1025_s1 + $0x98] sm:$0xff]  ;;  %v410_v55 = vld [vmem:[%s1027_s3 + $0x20] sm:$0xff]  ;;  %v219_v57 = vld [vmem:[%s1025_s1 + $0x90] sm:$0xff] }
  0x22   : > { %v409_v56 = vld [vmem:[%s1027_s3 + $0x18] sm:$0xff]  ;;  %v408_v58 = vld [vmem:[%s1027_s3 + $0x10] sm:$0xff]  ;;  %v407_v59 = vld [vmem:[%s1027_s3 + $0x8] sm:$0xff] }
  0x23   : > { %426 = vmatpush.msra.mxu2 %v417_v30  ;;  %v218_v60 = vld [vmem:[%s1025_s1 + $0x88] sm:$0xff]  ;;  %v406_v61 = vld [vmem:[%s1027_s3] sm:$0xff] }
  0x24   : > { %538 = vmatpush.xpose.msk.msra.mxu0 %vm233_vm0, %v212_v4  ;;  %580 = vmatpush.xpose.msk.msra.mxu3 %vm233_vm0, %v212_v4  ;;  %v217_v62 = vld [vmem:[%s1025_s1 + $0x80] sm:$0xff] }
  0x25   : > { %555 = vmatpush.xpose.msk.msra.mxu1 %vm233_vm0, %v229_v31  ;;  %427 = vmatpush.msra.mxu2 %v416_v32 }
  0x27   : > { %428 = vmatpush.msra.mxu2 %v415_v34 }
  0x28   : > { %539 = vmatpush.xpose.msk.msra.mxu0 %vm233_vm0, %v211_v5  ;;  %581 = vmatpush.xpose.msk.msra.mxu3 %vm233_vm0, %v211_v5 }
  0x29   : > { %556 = vmatpush.xpose.msk.msra.mxu1 %vm233_vm0, %v228_v36  ;;  %429 = vmatpush.msra.mxu2 %v414_v37 }
  0x2b   : > { %430 = vmatpush.msra.mxu2 %v413_v39 }
  0x2c   : > { %540 = vmatpush.xpose.msk.msra.mxu0 %vm233_vm0, %v210_v6  ;;  %582 = vmatpush.xpose.msk.msra.mxu3 %vm233_vm0, %v210_v6 }
  0x2d   : > { %557 = vmatpush.xpose.msk.msra.mxu1 %vm233_vm0, %v227_v40  ;;  %431 = vmatpush.msra.mxu2 %v412_v41 }
  0x2f   : > { %432 = vmatpush.msra.mxu2 %v411_v43 }
  0x30   : > { %541 = vmatpush.xpose.msk.msra.mxu0 %vm233_vm0, %v209_v7  ;;  %583 = vmatpush.xpose.msk.msra.mxu3 %vm233_vm0, %v209_v7 }
  0x31   : > { %558 = vmatpush.xpose.msk.msra.mxu1 %vm233_vm0, %v226_v45  ;;  %433 = vmatpush.msra.mxu2 %v410_v55 }
  0x33   : > { %434 = vmatpush.msra.mxu2 %v409_v56 }
  0x34   : > { %542 = vmatpush.xpose.msk.msra.mxu0 %vm233_vm0, %v208_v8  ;;  %584 = vmatpush.xpose.msk.msra.mxu3 %vm233_vm0, %v208_v8 }
  0x35   : > { %559 = vmatpush.xpose.msk.msra.mxu1 %vm233_vm0, %v225_v48  ;;  %435 = vmatpush.msra.mxu2 %v408_v58 }
  0x37   : > { %436 = vmatpush.msra.mxu2 %v407_v59 }
  0x38   : > { %543 = vmatpush.xpose.msk.msra.mxu0 %vm233_vm0, %v207_v9  ;;  %585 = vmatpush.xpose.msk.msra.mxu3 %vm233_vm0, %v207_v9 }
  0x39   : > { %560 = vmatpush.xpose.msk.msra.mxu1 %vm233_vm0, %v224_v49  ;;  %437 = vmatpush.msra.mxu2 %v406_v61 }
  0x3c   : > { %544 = vmatpush.xpose.msk.msra.mxu0 %vm233_vm0, %v206_v10  ;;  %586 = vmatpush.xpose.msk.msra.mxu3 %vm233_vm0, %v206_v10 }
  0x3d   : > { %561 = vmatpush.xpose.msk.msra.mxu1 %vm233_vm0, %v223_v51 }
  0x40   : > { %545 = vmatpush.xpose.msk.msra.mxu0 %vm233_vm0, %v205_v11  ;;  %587 = vmatpush.xpose.msk.msra.mxu3 %vm233_vm0, %v205_v11 }
  0x41   : > { %562 = vmatpush.xpose.msk.msra.mxu1 %vm233_vm0, %v222_v52 }
  0x44   : > { %546 = vmatpush.xpose.msk.msra.mxu0 %vm233_vm0, %v204_v12  ;;  %588 = vmatpush.xpose.msk.msra.mxu3 %vm233_vm0, %v204_v12 }
  0x45   : > { %563 = vmatpush.xpose.msk.msra.mxu1 %vm233_vm0, %v221_v53 }
  0x48   : > { %547 = vmatpush.xpose.msk.msra.mxu0 %vm233_vm0, %v203_v13  ;;  %589 = vmatpush.xpose.msk.msra.mxu3 %vm233_vm0, %v203_v13 }
  0x49   : > { %564 = vmatpush.xpose.msk.msra.mxu1 %vm233_vm0, %v220_v54 }
  0x4c   : > { %548 = vmatpush.xpose.msk.msra.mxu0 %vm233_vm0, %v202_v14  ;;  %590 = vmatpush.xpose.msk.msra.mxu3 %vm233_vm0, %v202_v14 }
  0x4d   : > { %565 = vmatpush.xpose.msk.msra.mxu1 %vm233_vm0, %v219_v57 }
  0x50   : > { %549 = vmatpush.xpose.msk.msra.mxu0 %vm233_vm0, %v201_v15  ;;  %591 = vmatpush.xpose.msk.msra.mxu3 %vm233_vm0, %v201_v15 }
  0x51   : > { %566 = vmatpush.xpose.msk.msra.mxu1 %vm233_vm0, %v218_v60 }
  0x53   : > { %550 = vmatmul.msk.f32.vlgmr.msra.gmra.mxu0 %vm233_vm0, %v865_v16  ;;  %551 = vmatmul.msk.f32.vlgmr.msra.gmra.mxu3 %vm233_vm0, %v867_v17 }
  0x55   : > { %567 = vmatpush.xpose.msk.msra.mxu1 %vm233_vm0, %v217_v62 }
  0x58   : > { %568 = vmatmul.msk.f32.vlgmr.msra.gmra.mxu1 %vm233_vm0, %v865_v16 }
  0x60   : > { %569 = vmatmul.msk.f32.gmra.mxu1 %vm233_vm0, %v867_v17 }
  0xd0   : > { %v353_v19 = vpop.f32.mrf.mxu0 }
  0xd1   : > { %v386_v20 = vsub.f32 %v353_v19, %v633_v18 }
  0xd3   : > { %388 = vmax.xlane.f32.xlu0 %v386_v20 }
  0xd5   : > { %v376_v5 = vpop.f32.mrf.mxu1 }
  0xd6   : > { %v356_v21 = vpop.f32.mrf.mxu3 }
  0xd7   : > { %v387_v22 = vsub.f32 %v356_v21, %v633_v18 }
  0xdb   : > { %390 = vmax.xlane.f32.xlu0 %v387_v22 }
  0xdd   : > { %v379_v8 = vpop.f32.mrf.mxu1 }
 0x146   : > { %v389_v33 = vpop.xlane.xlu0 %388 }
 0x147   : > { %v392_v35 = vsub.f32 %v386_v20, %v389_v33 }
 0x149   : > { %v394_v38 = vmul.f32 1.442695, %v392_v35 }
 0x14b   : > { %634 = vpow2.f32 %v394_v38 }
 0x14e   : > { %v391_v42 = vpop.xlane.xlu0 %390 }
 0x14f   : > { %v393_v44 = vsub.f32 %v387_v22, %v391_v42 }
 0x151   : > { %v635_v46 = vpop.eup %634  ;;  %v396_v47 = vmul.f32 1.442695, %v393_v44 }
 0x152   : > { %398 = vadd.xlane.f32.xlu1 %v635_v46 }
 0x153   : > { %636 = vpow2.f32 %v396_v47 }
 0x159   : > { %v637_v50 = vpop.eup %636 }
 0x15a   : > { %400 = vadd.xlane.f32.xlu1 %v637_v50 }
 0x1c5   : > { %v399_v63 = vpop.xlane.xlu1 %398 }
 0x1c6   : > { %638 = vrcp.f32 %v399_v63 }
 0x1cc   : > { %v639_v0 = vpop.eup %638 }
 0x1cd   : > { %v401_v1 = vpop.xlane.xlu1 %400  ;;  %v404_v2 = vmul.f32 %v639_v0, %v635_v46 }
 0x1ce   : > { %640 = vrcp.f32 %v401_v1 }
 0x1cf   : > { %438 = vmatmul.f32.vlgmr.msra.gmra.mxu2 %v404_v2 }
 0x1d4   : > { %v641_v3 = vpop.eup %640 }
 0x1d5   : > { %v405_v4 = vmul.f32 %v641_v3, %v637_v50 }
 0x1d7   : > { %441 = vmatmul.f32.gmra.mxu2 %v405_v4 }
 0x252   : > { %v439_v6 = vpop.f32.mrf.mxu2 }
 0x253   : > { %v445_v7 = vadd.f32 %v439_v6, %v376_v5 }
 0x255   : > { %447 = vst [vmem:[%s191_s8] sm:$0xff] %v445_v7 }
 0x25a   : > { %v442_v9 = vpop.f32.mrf.mxu2 }
 0x25b   : > { %v446_v10 = vadd.f32 %v442_v9, %v379_v8 }
 0x25d   : > { %448 = vst [vmem:[%s191_s8 + $0x8] sm:$0xff] %v446_v10 }
 0x25e   : > { %669 = shalt.err (!%p666_p3)
}
 0x25f   : > { %s706_s27 = smov 128   ;;  %s707_s28 = smov 8  }
 0x260   : > { %592 = dma.vmem_to_hbm [thread:$0]  (%p771_p5), %s463_s9, 256, %s465_s10, %s450_s11, %s706_s27, %s706_s27, %s707_s28  }
 0x261 PF: > { %p598_p4 = scmp.ge.s32.totalorder %s704_s18, 2  ;;  %s479_s29 = sand.u32 1, %s692_s15  }
 0x262   : > { %s480_s30 = scalar_lea.sflag [#allocation3], %s479_s29 }
 0x263   : > { %p595_p7 = pnand %p598_p4, %p775_p6 }
 0x265   : > { %p596_p8 = pneg %p595_p7 }
 0x267   : > { %687 = dma.done.wait (%p596_p8), %s480_s30, 256  }
 0x268   : > { %689 = vsyncadd (%p596_p8), %s480_s30, 4294967040  ;;  %p14_p9 = scmp.ge.s32.totalorder %s758_s21, 4   ;;  %s1031_s15 = smov %s696_s16 }
 0x269   : > { %s1032_s16 = smov %s700_s17  ;;  %s1033_s17 = smov %s769_s24 }
 0x26a   : > { %s1034_s18 = smov %s758_s21  ;;  %16 = sbr.rel (!%p14_p9) target bundleno = 3 (0x3), region = 71 }
 0x26f   :  { %486 = vsyncpa [#allocation3], 1 }
 0x270   :  { %488 = vsyncpa [#allocation3 + $0x1], 1 }

</bundles_post_ra>
